<compile_context>
chip_gen: v7x
topology: tpu7x:2x2x1
jax: 0.10.0
libtpu: 0.0.40
codegen_flags: <defaults>
</compile_context>

<pallas_src>
import math
import functools
import numpy as np

import jax
import jax.numpy as jnp
from jax.experimental import pallas as pl
from jax.experimental.pallas import tpu as pltpu


def _round_up(x, m):
    return ((x + m - 1) // m) * m


def _pick_tile(dim, desired, align):
    """Full-dim block for small dims (no padding).  For larger dims, prefer a tile that
    divides the dim exactly (multiple of `align`) so no padding copy is needed."""
    if dim <= desired:
        return dim, dim
    t = desired
    while t >= align:
        if dim % t == 0:
            return t, dim
        t -= align
    return desired, _round_up(dim, desired)


# ----------------------------------------------------------------------------
# In-kernel math helpers (must be called inside a pallas kernel)
# ----------------------------------------------------------------------------

def _gelu(x):
    # Exact (erf) GELU built from Mosaic-supported primitives.
    # erf via Abramowitz & Stegun 7.1.26 rational approximation; the divide uses the
    # EUP approximate reciprocal (free slot), total |err| ~1e-4 relative - fine for
    # bf16-operand inference.
    z = x * 0.7071067811865476
    az = jnp.abs(z)
    t = pl.reciprocal(1.0 + 0.3275911 * az, approx=True)
    poly = t * (0.254829592 + t * (-0.284496736 + t * (1.421413741
                + t * (-1.453152027 + t * 1.061405429))))
    erf_abs = 1.0 - poly * jnp.exp(-az * az)
    erf = jnp.where(z >= 0, erf_abs, -erf_abs)
    return 0.5 * x * (1.0 + erf)


def _layernorm(x, gamma, beta, eps):
    mu = jnp.mean(x, axis=-1, keepdims=True)
    xc = x - mu
    var = jnp.mean(xc * xc, axis=-1, keepdims=True)
    return xc * jax.lax.rsqrt(var + eps) * gamma + beta


# ----------------------------------------------------------------------------
# Fused tiled matmul: C = act(LN?(A) @ B + bias), single-K fast path
# ----------------------------------------------------------------------------

def _make_mm_kernel(activation, has_ln, single_k, eps):
    def kernel(*refs):
        idx = 0
        a_ref = refs[idx]; idx += 1
        if has_ln:
            g_ref = refs[idx]; idx += 1
            be_ref = refs[idx]; idx += 1
        b_ref = refs[idx]; idx += 1
        bias_ref = refs[idx]; idx += 1
        o_ref = refs[idx]; idx += 1
        acc_ref = None if single_k else refs[idx]

        a = a_ref[...]
        if has_ln:
            a = _layernorm(a.astype(jnp.float32), g_ref[...], be_ref[...], eps)
            a = a.astype(jnp.bfloat16)

        if single_k:
            # Degenerate K grid: no accumulator scratch, no pl.when - straight epilogue.
            out = jnp.dot(a, b_ref[...], preferred_element_type=jnp.float32) + bias_ref[...]
            if activation == "gelu":
                out = _gelu(out)
            o_ref[...] = out.astype(o_ref.dtype)
        else:
            @pl.when(pl.program_id(2) == 0)
            def _():
                acc_ref[...] = jnp.zeros_like(acc_ref)

            acc_ref[...] += jnp.dot(a, b_ref[...], preferred_element_type=jnp.float32)

            @pl.when(pl.program_id(2) == pl.num_programs(2) - 1)
            def _():
                out = acc_ref[...] + bias_ref[...]
                if activation == "gelu":
                    out = _gelu(out)
                o_ref[...] = out.astype(o_ref.dtype)

    return kernel


def fused_matmul(a, b, bias, *, activation=None, ln=None, out_dtype=jnp.float32,
                 tm=64, tn=256, tk=256, eps=1e-6):
    """a:(M,K), b:(K,N), bias:(N,).  bf16 MXU operands, f32 accumulation/epilogue.
    If ln=(gamma, beta) is given, LayerNorm(a) is fused as a prologue (requires a
    single K block)."""
    M, K = a.shape
    K2, N = b.shape
    assert K == K2
    has_ln = ln is not None
    b = b.astype(jnp.bfloat16)
    bias2 = bias.astype(jnp.float32).reshape(1, N)

    tm_e, Mp = _pick_tile(M, tm, 16)
    tn_e, Np = _pick_tile(N, tn, 128)
    tk_e, Kp = _pick_tile(K, tk, 128)
    single_k = (Kp // tk_e) == 1
    if has_ln:
        assert single_k and Kp == K, "LN prologue needs the full K in one block"

    a_in = a.astype(jnp.float32) if has_ln else a.astype(jnp.bfloat16)
    if (Mp, Kp) != (M, K):
        a_in = jnp.pad(a_in, ((0, Mp - M), (0, Kp - K)))
    if (Kp, Np) != (K, N):
        b = jnp.pad(b, ((0, Kp - K), (0, Np - N)))
    if Np != N:
        bias2 = jnp.pad(bias2, ((0, 0), (0, Np - N)))

    inputs = [a_in]
    in_specs = [pl.BlockSpec((tm_e, tk_e), lambda i, j, k: (i, k))]
    if has_ln:
        inputs += [ln[0].reshape(1, K).astype(jnp.float32),
                   ln[1].reshape(1, K).astype(jnp.float32)]
        in_specs += [pl.BlockSpec((1, tk_e), lambda i, j, k: (0, k)),
                     pl.BlockSpec((1, tk_e), lambda i, j, k: (0, k))]
    inputs += [b, bias2]
    in_specs += [pl.BlockSpec((tk_e, tn_e), lambda i, j, k: (k, j)),
                 pl.BlockSpec((1, tn_e), lambda i, j, k: (0, j))]

    scratch = [] if single_k else [pltpu.VMEM((tm_e, tn_e), jnp.float32)]

    out = pl.pallas_call(
        _make_mm_kernel(activation, has_ln, single_k, eps),
        out_shape=jax.ShapeDtypeStruct((Mp, Np), out_dtype),
        grid=(Mp // tm_e, Np // tn_e, Kp // tk_e),
        in_specs=in_specs,
        out_specs=pl.BlockSpec((tm_e, tn_e), lambda i, j, k: (i, j)),
        scratch_shapes=scratch,
        compiler_params=pltpu.CompilerParams(
            dimension_semantics=("parallel", "parallel", "arbitrary")),
    )(*inputs)
    if (Mp, Np) != (M, N):
        out = out[:M, :N]
    return out


# ----------------------------------------------------------------------------
# Fully fused transformer block:
#   x + proj(attn(LN1(x)));  x + fc2(GELU(fc1(LN2(x))))   in ONE pallas_call
# ----------------------------------------------------------------------------

def _fused_block_kernel(x_ref, ln1g_ref, ln1b_ref, qkvw_ref, qkvb_ref,
                        projw_ref, projb_ref, ln2g_ref, ln2b_ref,
                        fc1w_ref, fc1b_ref, fc2w_ref, fc2b_ref, o_ref,
                        *, num_heads, head_dim, scale, t_real, eps):
    D = num_heads * head_dim
    x = x_ref[0].astype(jnp.float32)                     # (Tp, D) residual stream (VMEM)
    Tp = x.shape[0]

    # ---- attention branch ----
    h = _layernorm(x, ln1g_ref[...], ln1b_ref[...], eps)
    qkv = jnp.dot(h.astype(jnp.bfloat16), qkvw_ref[...],
                  preferred_element_type=jnp.float32) + qkvb_ref[...]   # (Tp, 3D) f32

    # key-mask computed once, reused by all heads (padded key rows are invalid)
    key_valid = jax.lax.broadcasted_iota(jnp.int32, (Tp, Tp), 1) < t_real

    heads = []
    for hi in range(num_heads):
        q = qkv[:, hi * head_dim:(hi + 1) * head_dim]
        k = qkv[:, D + hi * head_dim:D + (hi + 1) * head_dim]
        v = qkv[:, 2 * D + hi * head_dim:2 * D + (hi + 1) * head_dim]
        s = jax.lax.dot_general(q.astype(jnp.bfloat16), k.astype(jnp.bfloat16),
                                (((1,), (1,)), ((), ())),
                                preferred_element_type=jnp.float32) * scale
        s = jnp.where(key_valid, s, -1e30)               # f32 softmax, masked padded keys
        s = s - jnp.max(s, axis=-1, keepdims=True)
        p = jnp.exp(s)
        p = p * pl.reciprocal(jnp.sum(p, axis=-1, keepdims=True), approx=True)
        heads.append(jnp.dot(p.astype(jnp.bfloat16), v.astype(jnp.bfloat16),
                             preferred_element_type=jnp.float32))
    attn = jnp.concatenate(heads, axis=-1)               # lane-dense (Tp, D), one consumer

    x = x + jnp.dot(attn.astype(jnp.bfloat16), projw_ref[...],
                    preferred_element_type=jnp.float32) + projb_ref[...]

    # ---- MLP branch ----
    h2 = _layernorm(x, ln2g_ref[...], ln2b_ref[...], eps)
    h2 = jnp.dot(h2.astype(jnp.bfloat16), fc1w_ref[...],
                 preferred_element_type=jnp.float32) + fc1b_ref[...]
    h2 = _gelu(h2)                                        # (Tp, 4D) never leaves VMEM
    x = x + jnp.dot(h2.astype(jnp.bfloat16), fc2w_ref[...],
                    preferred_element_type=jnp.float32) + fc2b_ref[...]

    o_ref[0, :, :] = x.astype(o_ref.dtype)


def transformer_block(x_pad, blk, num_heads, t_real, eps=1e-6):
    """x_pad: (BN, Tp, D) f32, Tp already a multiple of 16.  Returns (BN, Tp, D) f32.
    One pallas_call per block; grid over BN ('parallel' -> both v7x TensorCores)."""
    BN, Tp, D = x_pad.shape
    H = blk["fc1_w"].shape[1]
    dh = D // num_heads

    def row(v, n):
        return v.reshape(1, n).astype(jnp.float32)

    def rowspec(n):
        return pl.BlockSpec((1, n), lambda b: (0, 0))

    inputs = [
        x_pad,
        row(blk["ln1_g"], D), row(blk["ln1_b"], D),
        blk["qkv_w"], row(blk["qkv_b"], 3 * D),
        blk["proj_w"], row(blk["proj_b"], D),
        row(blk["ln2_g"], D), row(blk["ln2_b"], D),
        blk["fc1_w"], row(blk["fc1_b"], H),
        blk["fc2_w"], row(blk["fc2_b"], D),
    ]
    in_specs = [
        pl.BlockSpec((1, Tp, D), lambda b: (b, 0, 0)),
        rowspec(D), rowspec(D),
        pl.BlockSpec((D, 3 * D), lambda b: (0, 0)), rowspec(3 * D),
        pl.BlockSpec((D, D), lambda b: (0, 0)), rowspec(D),
        rowspec(D), rowspec(D),
        pl.BlockSpec((D, H), lambda b: (0, 0)), rowspec(H),
        pl.BlockSpec((H, D), lambda b: (0, 0)), rowspec(D),
    ]
    kern = functools.partial(_fused_block_kernel, num_heads=num_heads, head_dim=dh,
                             scale=1.0 / math.sqrt(dh), t_real=t_real, eps=eps)
    return pl.pallas_call(
        kern,
        out_shape=jax.ShapeDtypeStruct((BN, Tp, D), jnp.float32),
        grid=(BN,),
        in_specs=in_specs,
        out_specs=pl.BlockSpec((1, Tp, D), lambda b: (b, 0, 0)),
        compiler_params=pltpu.CompilerParams(dimension_semantics=("parallel",)),
    )(*inputs)


# ----------------------------------------------------------------------------
# RevIN normalize / de-normalize (row-tiled over batch*variates)
# ----------------------------------------------------------------------------

def _revin_kernel(x_ref, mean_ref, std_ref, xn_ref, *, norm_const, eps):
    x = x_ref[...]                                       # (rows, S)
    mu = jnp.mean(x, axis=-1, keepdims=True)
    xc = x - mu
    var = jnp.mean(xc * xc, axis=-1, keepdims=True)      # unbiased=False
    std = jnp.sqrt(var + eps) / norm_const
    mean_ref[...] = mu
    std_ref[...] = std
    xn_ref[...] = xc / std


def revin_normalize(x_rows, norm_const, tr=128):
    """x_rows: (R, S), R = B*N; returns means (R,1), stdev (R,1), normalized (R,S)."""
    R, S = x_rows.shape
    tr_e, Rp = _pick_tile(R, tr, 8)
    x_rows = x_rows.astype(jnp.float32)
    if Rp != R:
        x_rows = jnp.pad(x_rows, ((0, Rp - R), (0, 0)))
    mean, std, xn = pl.pallas_call(
        functools.partial(_revin_kernel, norm_const=norm_const, eps=1e-5),
        out_shape=(jax.ShapeDtypeStruct((Rp, 1), jnp.float32),
                   jax.ShapeDtypeStruct((Rp, 1), jnp.float32),
                   jax.ShapeDtypeStruct((Rp, S), jnp.float32)),
        grid=(Rp // tr_e,),
        in_specs=[pl.BlockSpec((tr_e, S), lambda i: (i, 0))],
        out_specs=(pl.BlockSpec((tr_e, 1), lambda i: (i, 0)),
                   pl.BlockSpec((tr_e, 1), lambda i: (i, 0)),
                   pl.BlockSpec((tr_e, S), lambda i: (i, 0))),
        compiler_params=pltpu.CompilerParams(dimension_semantics=("parallel",)),
    )(x_rows)
    return mean[:R], std[:R], xn[:R]


def _denorm_kernel(y_ref, std_ref, mean_ref, o_ref):
    o_ref[...] = y_ref[...] * std_ref[...] + mean_ref[...]


def revin_denormalize(y_rows, std_rows, mean_rows, tr=128):
    """y_rows: (R, P); std/mean: (R, 1).  Row layout (time on lanes)."""
    R, P = y_rows.shape
    tr_e, Rp = _pick_tile(R, tr, 8)
    if Rp != R:
        y_rows = jnp.pad(y_rows, ((0, Rp - R), (0, 0)))
        std_rows = jnp.pad(std_rows, ((0, Rp - R), (0, 0)))
        mean_rows = jnp.pad(mean_rows, ((0, Rp - R), (0, 0)))
    out = pl.pallas_call(
        _denorm_kernel,
        out_shape=jax.ShapeDtypeStruct((Rp, P), jnp.float32),
        grid=(Rp // tr_e,),
        in_specs=[pl.BlockSpec((tr_e, P), lambda i: (i, 0)),
                  pl.BlockSpec((tr_e, 1), lambda i: (i, 0)),
                  pl.BlockSpec((tr_e, 1), lambda i: (i, 0))],
        out_specs=pl.BlockSpec((tr_e, P), lambda i: (i, 0)),
        compiler_params=pltpu.CompilerParams(dimension_semantics=("parallel",)),
    )(y_rows.astype(jnp.float32), std_rows.astype(jnp.float32),
      mean_rows.astype(jnp.float32))
    return out[:R]


# ----------------------------------------------------------------------------
# MAE ViT (synthetic weights) built on the kernels above
# ----------------------------------------------------------------------------

class MAEConfig:
    img_size = 32
    patch_size = 8
    in_chans = 3
    embed_dim = 64
    depth = 2
    num_heads = 4
    dec_embed_dim = 64
    dec_depth = 1
    dec_num_heads = 4
    mlp_ratio = 4


def _sincos_1d(embed_dim, pos):
    omega = np.arange(embed_dim // 2, dtype=np.float64) / (embed_dim / 2.0)
    omega = 1.0 / (10000 ** omega)
    out = np.einsum("m,d->md", pos.reshape(-1).astype(np.float64), omega)
    return np.concatenate([np.sin(out), np.cos(out)], axis=1)


def get_2d_sincos_pos_embed(embed_dim, grid_size, cls_token=False):
    grid_h = np.arange(grid_size, dtype=np.float32)
    grid_w = np.arange(grid_size, dtype=np.float32)
    grid = np.meshgrid(grid_w, grid_h)
    grid = np.stack(grid, axis=0).reshape([2, 1, grid_size, grid_size])
    emb_h = _sincos_1d(embed_dim // 2, grid[0])
    emb_w = _sincos_1d(embed_dim // 2, grid[1])
    emb = np.concatenate([emb_h, emb_w], axis=1)
    if cls_token:
        emb = np.concatenate([np.zeros([1, embed_dim]), emb], axis=0)
    return emb.astype(np.float32)


def _normal(key, shape, std=0.02):
    return std * jax.random.normal(key, shape, jnp.float32)


def init_mae_params(key, cfg):
    p = cfg.patch_size
    D, Dd = cfg.embed_dim, cfg.dec_embed_dim
    grid = cfg.img_size // p
    keys = iter(jax.random.split(key, 256))

    def nk():
        return next(keys)

    def w_bf16(shape):                 # matmul weights stored bf16 (MXU operands)
        return _normal(nk(), shape).astype(jnp.bfloat16)

    def make_block(dim, mlp_ratio):
        h = dim * mlp_ratio
        return {
            "ln1_g": jnp.ones((dim,), jnp.float32), "ln1_b": jnp.zeros((dim,), jnp.float32),
            "qkv_w": w_bf16((dim, 3 * dim)), "qkv_b": jnp.zeros((3 * dim,), jnp.float32),
            "proj_w": w_bf16((dim, dim)), "proj_b": jnp.zeros((dim,), jnp.float32),
            "ln2_g": jnp.ones((dim,), jnp.float32), "ln2_b": jnp.zeros((dim,), jnp.float32),
            "fc1_w": w_bf16((dim, h)), "fc1_b": jnp.zeros((h,), jnp.float32),
            "fc2_w": w_bf16((h, dim)), "fc2_b": jnp.zeros((dim,), jnp.float32),
        }

    params = {
        "patch_w": w_bf16((cfg.in_chans * p * p, D)),
        "patch_b": jnp.zeros((D,), jnp.float32),
        "cls_token": _normal(nk(), (D,)),
        "pos_embed": jnp.asarray(get_2d_sincos_pos_embed(D, grid, cls_token=True)),
        "norm_g": jnp.ones((D,), jnp.float32),
        "norm_b": jnp.zeros((D,), jnp.float32),
        "dec_embed_w": w_bf16((D, Dd)),
        "dec_embed_b": jnp.zeros((Dd,), jnp.float32),
        "mask_token": _normal(nk(), (Dd,)),
        "dec_pos_embed": jnp.asarray(get_2d_sincos_pos_embed(Dd, grid, cls_token=True)),
        "dec_norm_g": jnp.ones((Dd,), jnp.float32),
        "dec_norm_b": jnp.zeros((Dd,), jnp.float32),
        "dec_pred_w": w_bf16((Dd, p * p * cfg.in_chans)),
        "dec_pred_b": jnp.zeros((p * p * cfg.in_chans,), jnp.float32),
        "blocks": [make_block(D, cfg.mlp_ratio) for _ in range(cfg.depth)],
        "dec_blocks": [make_block(Dd, cfg.mlp_ratio) for _ in range(cfg.dec_depth)],
    }
    return params


def mae_forward(imgs, noise, mask_ratio, params, cfg):
    """imgs: (BN, 3, H, W) NCHW; noise: (BN, L).  Returns pred patches (BN, L, p*p*3)."""
    BN = imgs.shape[0]
    p = cfg.patch_size
    gh = gw = cfg.img_size // p
    L = gh * gw
    D, Dd = cfg.embed_dim, cfg.dec_embed_dim

    # patch embedding: conv(kernel=p, stride=p) as a tiled matmul over flattened patches
    xp = imgs.reshape(BN, cfg.in_chans, gh, p, gw, p)
    xp = jnp.transpose(xp, (0, 2, 4, 1, 3, 5)).reshape(BN * L, cfg.in_chans * p * p)
    tok = fused_matmul(xp, params["patch_w"], params["patch_b"]).reshape(BN, L, D)
    tok = tok + params["pos_embed"][1:][None]

    # random_masking driven by the deterministic noise (= VisionTS mask buffer)
    len_keep = int(L * (1 - mask_ratio))
    ids_shuffle = jnp.argsort(noise, axis=1, stable=True)
    ids_restore = jnp.argsort(ids_shuffle, axis=1, stable=True)
    ids_keep = ids_shuffle[:, :len_keep]
    x_masked = jnp.take_along_axis(tok, ids_keep[:, :, None], axis=1)

    cls = (params["cls_token"] + params["pos_embed"][0])[None, None, :]
    x = jnp.concatenate([jnp.broadcast_to(cls, (BN, 1, D)), x_masked], axis=1)

    # ---- encoder blocks: pad token axis once (multiple of 16), keep padded through ----
    T = x.shape[1]
    Tp = _round_up(T, 16)
    if Tp != T:
        x = jnp.pad(x.astype(jnp.float32), ((0, 0), (0, Tp - T), (0, 0)))
    else:
        x = x.astype(jnp.float32)
    for blk in params["blocks"]:
        x = transformer_block(x, blk, cfg.num_heads, T)
    x = x[:, :T, :]

    # encoder final LayerNorm fused as prologue of the decoder-embed matmul
    x = fused_matmul(x.reshape(BN * T, D), params["dec_embed_w"], params["dec_embed_b"],
                     ln=(params["norm_g"], params["norm_b"])).reshape(BN, T, Dd)

    # decoder: append mask tokens, unshuffle, add pos embed
    mask_tok = jnp.broadcast_to(params["mask_token"][None, None, :], (BN, L + 1 - T, Dd))
    x_ = jnp.concatenate([x[:, 1:, :], mask_tok], axis=1)
    x_ = jnp.take_along_axis(x_, ids_restore[:, :, None], axis=1)      # unshuffle
    x = jnp.concatenate([x[:, :1, :], x_], axis=1)
    x = x + params["dec_pos_embed"][None]

    Td = x.shape[1]
    Tdp = _round_up(Td, 16)
    if Tdp != Td:
        x = jnp.pad(x.astype(jnp.float32), ((0, 0), (0, Tdp - Td), (0, 0)))
    else:
        x = x.astype(jnp.float32)
    for blk in params["dec_blocks"]:
        x = transformer_block(x, blk, cfg.dec_num_heads, Td)
    x = x[:, :Td, :]

    # decoder final LayerNorm fused as prologue of the prediction matmul
    pred = fused_matmul(x.reshape(BN * Td, Dd), params["dec_pred_w"], params["dec_pred_b"],
                        ln=(params["dec_norm_g"], params["dec_norm_b"])
                        ).reshape(BN, Td, p * p * cfg.in_chans)
    return pred[:, 1:, :]


def unpatchify(pred, cfg):
    p = cfg.patch_size
    gh = gw = cfg.img_size // p
    BN = pred.shape[0]
    x = pred.reshape(BN, gh, gw, p, p, cfg.in_chans)
    x = jnp.transpose(x, (0, 5, 1, 3, 2, 4))            # 'nhwpqc->nchpwq'
    return x.reshape(BN, cfg.in_chans, gh * p, gw * p)


# ----------------------------------------------------------------------------
# VisionTS wrapper
# ----------------------------------------------------------------------------

class VisionTSPallas:
    def __init__(self, key, cfg=None):
        self.cfg = cfg if cfg is not None else MAEConfig()
        self.params = init_mae_params(key, self.cfg)

    def update_config(self, context_len, pred_len, periodicity=1,
                      norm_const=0.4, align_const=0.4):
        cfg = self.cfg
        self.image_size = cfg.img_size
        self.patch_size = cfg.patch_size
        self.num_patch = self.image_size // self.patch_size
        self.context_len = context_len
        self.pred_len = pred_len
        self.periodicity = periodicity
        self.pad_left = 0
        self.pad_right = 0
        if context_len % periodicity != 0:
            self.pad_left = periodicity - context_len % periodicity
        if pred_len % periodicity != 0:
            self.pad_right = periodicity - pred_len % periodicity
        input_ratio = (self.pad_left + context_len) / (
            self.pad_left + context_len + self.pad_right + pred_len)
        self.num_patch_input = int(input_ratio * self.num_patch * align_const)
        if self.num_patch_input == 0:
            self.num_patch_input = 1
        self.num_patch_output = self.num_patch - self.num_patch_input
        adjust_input_ratio = self.num_patch_input / self.num_patch
        self.input_resize_hw = (self.image_size, int(self.image_size * adjust_input_ratio))
        self.scale_x = ((self.pad_left + context_len) // periodicity) / int(
            self.image_size * adjust_input_ratio)
        self.output_resize_hw = (periodicity, int(round(self.image_size * self.scale_x)))
        self.norm_const = norm_const
        mask = np.ones((self.num_patch, self.num_patch), np.float32)
        mask[:, :self.num_patch_input] = 0.0
        self.mask = jnp.asarray(mask.reshape(1, -1))
        self.mask_ratio = float(mask.mean())

    def forward(self, x):
        # x: (B, context_len, N) float32
        B, S, NV = x.shape
        cfg = self.cfg
        R = B * NV

        # 1) instance norm (RevIN) - row-tiled Pallas reduction on (B*N, S)
        x_rows = jnp.transpose(x, (0, 2, 1)).reshape(R, S).astype(jnp.float32)
        means_r, stdev_r, x_enc = revin_normalize(x_rows, self.norm_const)

        # 2) left replicate pad + fold into per-variate (periodicity, periods) image
        if self.pad_left > 0:
            x_pad = jnp.pad(x_enc, ((0, 0), (self.pad_left, 0)), mode="edge")
        else:
            x_pad = x_enc
        P_in = x_pad.shape[-1] // self.periodicity
        x_2d = x_pad.reshape(R, P_in, self.periodicity)               # (b n, p, f)
        x_2d = jnp.transpose(x_2d, (0, 2, 1)).reshape(R, 1, self.periodicity, P_in)

        # 3) resize to visible region, append masked region, repeat to 3 channels
        # TODO(synk): bilinear resize (torchvision Resize) done with jax.image.resize
        #             glue rather than a dedicated Pallas kernel.
        H, W_in = self.input_resize_hw
        x_resize = jax.image.resize(x_2d, (R, 1, H, W_in),
                                    method="bilinear", antialias=False)
        masked = jnp.zeros((R, 1, H, self.num_patch_output * self.patch_size), jnp.float32)
        image_input = jnp.concatenate([x_resize, masked], axis=-1)
        image_input = jnp.broadcast_to(image_input, (R, 3, H, self.image_size))

        # 4) MAE encoder/decoder (fused-block / LN-prologue-matmul Pallas kernels)
        noise = jnp.broadcast_to(self.mask, (R, self.mask.shape[-1]))
        pred = mae_forward(image_input, noise, self.mask_ratio, self.params, cfg)

        # 5) unpatchify -> grey -> resize back -> unfold to time series
        img_rec = unpatchify(pred, cfg)                               # (BN, 3, H, W)
        y_grey = jnp.mean(img_rec, axis=1, keepdims=True)             # (BN, 1, H, W)
        f_out, p_out = self.output_resize_hw
        y_seg = jax.image.resize(y_grey, (R, 1, f_out, p_out),
                                 method="bilinear", antialias=False)
        # '(b n) 1 f p -> (b n) (p f)'
        y_time = jnp.transpose(y_seg.reshape(R, f_out, p_out), (0, 2, 1)).reshape(
            R, p_out * f_out)
        start = self.pad_left + self.context_len
        y_win = y_time[:, start:start + self.pred_len]                # (B*N, pred_len)

        # 6) de-normalize in row layout (time on lanes), then transpose in glue
        y_den = revin_denormalize(y_win, stdev_r, means_r)            # (B*N, pred_len)
        return jnp.transpose(y_den.reshape(B, NV, self.pred_len), (0, 2, 1))


# ----------------------------------------------------------------------------
# main
# ----------------------------------------------------------------------------

if __name__ == "__main__":
    key = jax.random.PRNGKey(0)
    pkey, xkey = jax.random.split(key)

    cfg = MAEConfig()
    model = VisionTSPallas(pkey, cfg)

    context_len, pred_len, periodicity = 36, 12, 4
    model.update_config(context_len, pred_len, periodicity=periodicity,
                        norm_const=0.4, align_const=0.4)

    B, NV = 2, 3
    x = jax.random.normal(xkey, (B, context_len, NV), jnp.float32)

    y = model.forward(x)
    y = jax.block_until_ready(y)

    assert y.shape == (B, pred_len, NV), y.shape
    assert bool(jnp.all(jnp.isfinite(y)))
    print("KERNEL_OK")
</pallas_src>

<mosaic_0001>
module attributes {stable_mosaic.version = 11 : i64} {
  func.func @_revin_kernel(%arg0: i32, %arg1: memref<6x36xf32, #tpu.memory_space<vmem>>, %arg2: memref<6x1xf32, #tpu.memory_space<vmem>>, %arg3: memref<6x1xf32, #tpu.memory_space<vmem>>, %arg4: memref<6x36xf32, #tpu.memory_space<vmem>>) attributes {dimension_semantics = [#tpu.dimension_semantics<parallel>], iteration_bounds = array<i64: 1>, scalar_prefetch = 0 : i64, scratch_operands = 0 : i64, tpu.core_type = #tpu.core_type<tc>, window_params = [{transform_indices = @transform_0, window_bounds = array<i64: 6, 36>}, {transform_indices = @transform_1, window_bounds = array<i64: 6, 1>}, {transform_indices = @transform_2, window_bounds = array<i64: 6, 1>}, {transform_indices = @transform_3, window_bounds = array<i64: 6, 36>}]} {
    %c0 = arith.constant 0 : index
    %c0_0 = arith.constant 0 : index
    %0 = vector.load %arg1[%c0, %c0_0] : memref<6x36xf32, #tpu.memory_space<vmem>>, vector<6x36xf32>
    %cst = arith.constant dense<0.000000e+00> : vector<6xf32>
    %1 = vector.multi_reduction <add>, %0, %cst [1] : vector<6x36xf32> to vector<6xf32>
    %2 = vector.shape_cast %1 : vector<6xf32> to vector<6x1xf32>
    %cst_1 = arith.constant 3.600000e+01 : f32
    %3 = vector.broadcast %cst_1 : f32 to vector<6x1xf32>
    %4 = arith.divf %2, %3 : vector<6x1xf32>
    %5 = vector.broadcast %4 : vector<6x1xf32> to vector<6x36xf32>
    %6 = arith.subf %0, %5 : vector<6x36xf32>
    %7 = arith.mulf %6, %6 : vector<6x36xf32>
    %cst_2 = arith.constant dense<0.000000e+00> : vector<6xf32>
    %8 = vector.multi_reduction <add>, %7, %cst_2 [1] : vector<6x36xf32> to vector<6xf32>
    %9 = vector.shape_cast %8 : vector<6xf32> to vector<6x1xf32>
    %cst_3 = arith.constant 3.600000e+01 : f32
    %10 = vector.broadcast %cst_3 : f32 to vector<6x1xf32>
    %11 = arith.divf %9, %10 : vector<6x1xf32>
    %cst_4 = arith.constant 9.99999974E-6 : f32
    %12 = vector.broadcast %cst_4 : f32 to vector<6x1xf32>
    %13 = arith.addf %11, %12 : vector<6x1xf32>
    %14 = math.sqrt %13 : vector<6x1xf32>
    %cst_5 = arith.constant 4.000000e-01 : f32
    %15 = vector.broadcast %cst_5 : f32 to vector<6x1xf32>
    %16 = arith.divf %14, %15 : vector<6x1xf32>
    %c0_6 = arith.constant 0 : index
    %c0_7 = arith.constant 0 : index
    %17 = vector.load %arg2[%c0_6, %c0_7] : memref<6x1xf32, #tpu.memory_space<vmem>>, vector<6x1xf32>
    tpu.vector_store %arg2[%c0_6, %c0_7], %4 {strides = array<i32>} : memref<6x1xf32, #tpu.memory_space<vmem>>, vector<6x1xf32>,
    %c0_8 = arith.constant 0 : index
    %c0_9 = arith.constant 0 : index
    %18 = vector.load %arg3[%c0_8, %c0_9] : memref<6x1xf32, #tpu.memory_space<vmem>>, vector<6x1xf32>
    tpu.vector_store %arg3[%c0_8, %c0_9], %16 {strides = array<i32>} : memref<6x1xf32, #tpu.memory_space<vmem>>, vector<6x1xf32>,
    %19 = vector.broadcast %16 : vector<6x1xf32> to vector<6x36xf32>
    %20 = arith.divf %6, %19 : vector<6x36xf32>
    %c0_10 = arith.constant 0 : index
    %c0_11 = arith.constant 0 : index
    %21 = vector.load %arg4[%c0_10, %c0_11] : memref<6x36xf32, #tpu.memory_space<vmem>>, vector<6x36xf32>
    tpu.vector_store %arg4[%c0_10, %c0_11], %20 {strides = array<i32>} : memref<6x36xf32, #tpu.memory_space<vmem>>, vector<6x36xf32>,
    return
  }
  func.func @transform_0(%arg0: i32) -> (i32, i32) {
    %c0_i32 = arith.constant 0 : i32
    %c0_i32_0 = arith.constant 0 : i32
    return %arg0, %c0_i32 : i32, i32
  }
  func.func @transform_1(%arg0: i32) -> (i32, i32) {
    %c0_i32 = arith.constant 0 : i32
    %c0_i32_0 = arith.constant 0 : i32
    return %arg0, %c0_i32 : i32, i32
  }
  func.func @transform_2(%arg0: i32) -> (i32, i32) {
    %c0_i32 = arith.constant 0 : i32
    %c0_i32_0 = arith.constant 0 : i32
    return %arg0, %c0_i32 : i32, i32
  }
  func.func @transform_3(%arg0: i32) -> (i32, i32) {
    %c0_i32 = arith.constant 0 : i32
    %c0_i32_0 = arith.constant 0 : i32
    return %arg0, %c0_i32 : i32, i32
  }
}

</mosaic_0001>

<bundles_post_ra>
// kernel: tpu_custom_call.1
= control target key start
LH: loop header
LB: loop body
LE: loop exit
PB: predicated region body
PF: predicated region fallthrough
CT: control target
= control target key end

     0   :  { %9 = vsyncpa [#allocation3], 0  ;;  %s187_s0 = inlined_call_operand.hbm [shape: f32[6,36], index: 0, kind: input, shape index: {}]   ;;  %s188_s1 = inlined_call_operand.vmem [shape: f32[6,1], index: 1, kind: output, shape index: {0}]   ;;  %s189_s2 = inlined_call_operand.vmem [shape: f32[6,1], index: 2, kind: output, shape index: {1}]   ;;  %s190_s3 = inlined_call_operand.hbm [shape: f32[6,36], index: 3, kind: output, shape index: {2}]  }
   0x1   :  { %10 = vsyncpa [#allocation4], 0  ;;  %s130_s12 = smov [#allocation2]   ;;  %s82_s16 = scalar_lea.hbm %s187_s0, 128 }
   0x2   :  { %s17_s13 = sshll.u32 %s130_s12, 4  ;;  %p83_p0 = scmp.ne.s32.totalorder %s187_s0, %s82_s16  ;;  %s18_s13 = int_to_ptr.vmem [resolvable:$true] %s17_s13 }
   0x3   :  { %p86_p1 = scmp.lt.u32.totalorder %s82_s16, %s187_s0 }
   0x5   :  { %p88_p2 = pnand %p86_p1, %p83_p0 }
   0x7   :  { %91 = shalt.err (!%p88_p2)
}
   0x8   :  { %s92_s21 = scalar_lea.vmem %s18_s13, 128  ;;  %p97_p4 = scmp.lt.s32.totalorder %s18_s13, %s18_s13 }
   0x9   :  { %p93_p3 = scmp.ne.s32.totalorder %s18_s13, %s92_s21  ;;  %p98_p5 = scmp.lt.s32.totalorder %s92_s21, %s92_s21 }
   0xb   :  { %p99_p6 = por %p98_p5, %p97_p4 }
   0xd   :  { %p100_p7 = pnand %p99_p6, %p93_p3 }
   0xf   :  { %103 = shalt.err (!%p100_p7)
}
  0x10   :  { %20 = dma.hbm_to_vmem [thread:$0]  %s187_s0, 128, %s18_s13, [#allocation3]  }
  0x11   :  { %126 = dma.done.wait [#allocation3], 128  }
  0x12   :  { %127 = vsyncadd [#allocation3], 4294967168  ;;  %vm25_vm0 = vcmask 291840   ;;  %v24_v0 = vld [vmem:[#allocation2] sm:$0x3f]  ;;  %vm47_vm1 = vcmask 5120  }
  0x13   :  { %v26_v1 = vsel %vm25_vm0, %v24_v0, 0.0 }
  0x14   :  { %27 = vadd.xlane.f32.xlu0 %v26_v1 }
  0xa1   :  { %v28_v2 = vpop.xlane.xlu0 %27 }
  0xa2   :  { %v30_v3 = vmul.f32 0.027777778, %v28_v2 }
  0xa4   :  { %v31_v4 = vsub.f32 %v24_v0, %v30_v3  ;;  %48 = vst.msk [vmem:[%s188_s1] sm:$0x3f] %vm47_vm1, %v30_v3  ;;  %s131_s1 = smov [#allocation5]  }
  0xa5   :  { %s63_s27 = sshll.u32 %s131_s1, 4  ;;  %s64_s27 = int_to_ptr.vmem [resolvable:$true] %s63_s27 }
  0xa6   :  { %v32_v5 = vmul.f32 %v31_v4, %v31_v4  ;;  %s104_s28 = scalar_lea.vmem %s64_s27, 128  ;;  %p109_p9 = scmp.lt.s32.totalorder %s64_s27, %s64_s27 }
  0xa7   :  { %p105_p8 = scmp.ne.s32.totalorder %s64_s27, %s104_s28  ;;  %p110_p10 = scmp.lt.s32.totalorder %s104_s28, %s104_s28 }
  0xa8   :  { %v33_v6 = vsel %vm25_vm0, %v32_v5, 0.0 }
  0xa9   :  { %34 = vadd.xlane.f32.xlu0 %v33_v6  ;;  %p111_p11 = por %p110_p10, %p109_p9 }
  0xab   :  { %p112_p12 = pnand %p111_p11, %p105_p8 }
 0x136   :  { %v35_v7 = vpop.xlane.xlu0 %34 }
 0x137   :  { %v36_v8 = vmul.f32 0.027777778, %v35_v7 }
 0x139   :  { %v37_v9 = vadd.f32 1e-05, %v36_v8 }
 0x13b   :  { %78 = vrsqrt.f32 %v37_v9  ;;  %vm40_vm2 = vcmp.eq.f32.partialorder %v37_v9, inf  ;;  %v43_v12 = vand.u32 2147483648, %v37_v9  ;;  %vm42_vm3 = vcmp.eq.f32.partialorder %v37_v9, 0.0 }
 0x145   :  { %v79_v10 = vpop.eup %78 }
 0x146   :  { %v39_v11 = vmul.f32 %v79_v10, %v37_v9 }
 0x148   :  { %v41_v13 = vsel %vm40_vm2, %v37_v9, %v39_v11 }
 0x149   :  { %v44_v14 = vsel %vm42_vm3, %v43_v12, %v41_v13 }
 0x14a   :  { %v46_v15 = vmul.f32 2.5, %v44_v14 }
 0x14c   :  { %49 = vst.msk [vmem:[%s189_s2] sm:$0x3f] %vm47_vm1, %v46_v15  ;;  %80 = vrcp.f32 %v46_v15 }
 0x156   :  { %v81_v16 = vpop.eup %80 }
 0x157   :  { %v51_v17 = vmul.f32 %v81_v16, %v31_v4 }
 0x159   :  { %52 = vst.msk [vmem:[#allocation5] sm:$0x3f] %vm25_vm0, %v51_v17 }
 0x15a   :  { %115 = shalt.err (!%p112_p12)
}
 0x15b   :  { %s116_s4 = scalar_lea.hbm %s190_s3, 128 }
 0x15c   :  { %p117_p13 = scmp.ne.s32.totalorder %s190_s3, %s116_s4  ;;  %p120_p0 = scmp.lt.u32.totalorder %s116_s4, %s190_s3 }
 0x15e   :  { %p122_p1 = pnand %p120_p0, %p117_p13 }
 0x160   :  { %125 = shalt.err (!%p122_p1)
}
 0x161   :  { %66 = dma.vmem_to_hbm [thread:$0]  %s64_s27, 128, %s190_s3, [#allocation4]  }
 0x162   :  { %128 = dma.done.wait [#allocation4], 128  }
 0x163   :  { %129 = vsyncadd [#allocation4], 4294967168 }
 0x164   :  { %74 = vsyncpa [#allocation3], 1 }
 0x165   :  { %75 = vsyncpa [#allocation4], 1 }

</bundles_post_ra>
